<compile_context>
chip_gen: v7x
topology: tpu7x:2x2x1
jax: 0.10.0
libtpu: 0.0.40
codegen_flags: <defaults>
</compile_context>

<pallas_src>
import functools

import jax
import jax.numpy as jnp
from jax.experimental import pallas as pl
from jax.experimental.pallas import tpu as pltpu


def _round_up(x: int, m: int) -> int:
    return (x + m - 1) // m * m


def _choose_batch_tile(batch: int, tile_m: int) -> tuple[int, int]:
    """Pick (rows-per-grid-step, padded batch) minimizing padding for a max tile."""
    n_steps = max(1, pl.cdiv(batch, tile_m))
    tm = _round_up(pl.cdiv(batch, n_steps), 8)   # sublane-aligned tile
    return tm, tm * n_steps


def _mlp_kernel(x_ref, *refs):
    """Fused MLP forward for one batch tile.

    refs = (w0, b0, w1, b1, ..., w_out, b_out, out_ref)
    Hidden layers: ReLU; output layer: no activation.
    bf16 matmul operands, f32 MXU accumulation, f32 bias add.
    """
    out_ref = refs[-1]
    param_refs = refs[:-1]
    n_layers = len(param_refs) // 2

    h = x_ref[...].astype(jnp.bfloat16)
    for i in range(n_layers):
        w = param_refs[2 * i][...]        # bf16, (in, out)
        b = param_refs[2 * i + 1][...]    # f32,  (1, out) -> broadcasts over rows
        y = jnp.dot(h, w, preferred_element_type=jnp.float32) + b
        if i < n_layers - 1:
            h = jnp.maximum(y, 0.0).astype(jnp.bfloat16)   # ReLU, back to bf16 for MXU
        else:
            h = y                                          # logits stay f32
    out_ref[...] = h.astype(out_ref.dtype)


def network_reduced_forward(x, params, *, tile_m: int = 256):
    """Run the fused MLP kernel.

    Args:
      x: (batch, input_size) f32 (or bf16) array.
      params: list of (W, b) tuples, W (in, out) bf16, b (1, out) f32.
              Last tuple is the output layer (no ReLU).
      tile_m: max batch rows per grid step (128 on v5e, 256 on v6e/v7x).
    Returns:
      (batch, output_size) f32 logits.
    """
    batch, in_size = x.shape
    out_size = params[-1][0].shape[1]

    # --- lane-dense output: pad final layer's columns to a multiple of 128 ---
    out_pad = _round_up(out_size, 128)
    w_last, b_last = params[-1]
    if out_pad != out_size:
        w_last = jnp.pad(w_last, ((0, 0), (0, out_pad - out_size)))
        b_last = jnp.pad(b_last, ((0, 0), (0, out_pad - out_size)))
    kparams = list(params[:-1]) + [(w_last, b_last)]

    # --- batch tiling: minimal padding, sublane-aligned tile ---
    tm, batch_pad = _choose_batch_tile(batch, tile_m)
    if batch_pad != batch:
        x = jnp.pad(x, ((0, batch_pad - batch), (0, 0)))
    grid = (batch_pad // tm,)

    # --- specs: tile x/out over batch; weights/biases are full, resident blocks ---
    in_specs = [pl.BlockSpec((tm, in_size), lambda i: (i, 0))]
    flat_params = []
    for w, b in kparams:
        flat_params.append(w)
        flat_params.append(b)
        in_specs.append(pl.BlockSpec(w.shape, lambda i: (0, 0)))
        in_specs.append(pl.BlockSpec(b.shape, lambda i: (0, 0)))
    out_specs = pl.BlockSpec((tm, out_pad), lambda i: (i, 0))

    # --- VMEM budget with headroom (portable to v7x's 32 MiB scoped default) ---
    x_bytes = tm * in_size * x.dtype.itemsize
    o_bytes = tm * out_pad * 4
    w_bytes = sum(w.size * w.dtype.itemsize + b.size * b.dtype.itemsize
                  for w, b in kparams)
    vmem_limit = min(4 * (2 * (x_bytes + o_bytes) + w_bytes) + (8 << 20), 32 << 20)

    # --- advisory cost estimate for XLA's scheduler ---
    flops = 2 * batch_pad * sum(w.shape[0] * w.shape[1] for w, _ in kparams)
    bytes_accessed = (batch_pad * in_size * x.dtype.itemsize
                      + batch_pad * out_pad * 4 + w_bytes)
    cost = pl.CostEstimate(flops=flops, transcendentals=0,
                           bytes_accessed=bytes_accessed)

    out = pl.pallas_call(
        _mlp_kernel,
        out_shape=jax.ShapeDtypeStruct((batch_pad, out_pad), jnp.float32),
        grid=grid,
        in_specs=in_specs,
        out_specs=out_specs,
        compiler_params=pltpu.CompilerParams(
            dimension_semantics=("parallel",),   # megacore-shardable on v7x
            vmem_limit_bytes=int(vmem_limit),
        ),
        cost_estimate=cost,
    )(x, *flat_params)

    return out[:batch, :out_size]


def init_params(key, input_size, output_size, hidden_layers):
    """Parameter init matching NetworkReduced's layer shapes.

    Weights are created in PyTorch's (out, in) convention then transposed to
    (in, out) and cast to bf16; biases stay f32, reshaped to (1, out) so the
    in-kernel bias add is a pure VPU broadcast.
    """
    sizes = [input_size] + list(hidden_layers) + [output_size]
    params = []
    for i in range(len(sizes) - 1):
        fan_in, fan_out = sizes[i], sizes[i + 1]
        key, kw, kb = jax.random.split(key, 3)
        bound = 1.0 / jnp.sqrt(fan_in)
        w_torch = jax.random.uniform(
            kw, (fan_out, fan_in), jnp.float32, minval=-bound, maxval=bound
        )
        b = jax.random.uniform(
            kb, (fan_out,), jnp.float32, minval=-bound, maxval=bound
        )
        params.append((w_torch.T.astype(jnp.bfloat16), b.reshape(1, fan_out)))
    return params


def reference_forward(x, params):
    """Pure-JAX reference mirroring the kernel's bf16-matmul / f32-accumulate math."""
    h = x.astype(jnp.bfloat16)
    y = None
    for i, (w, b) in enumerate(params):
        y = jnp.dot(h, w, preferred_element_type=jnp.float32) + b
        if i < len(params) - 1:
            h = jnp.maximum(y, 0.0).astype(jnp.bfloat16)
    return y


def reference_forward_f32(x, params):
    """Full-f32 reference of the PyTorch module (semantics sanity check)."""
    h = x
    for i, (w, b) in enumerate(params):
        h = h @ w.astype(jnp.float32) + b
        if i < len(params) - 1:
            h = jnp.maximum(h, 0.0)
    return h


if __name__ == "__main__":
    # Shapes consistent with the module: 16-dim state vector, two hidden layers of 32,
    # 4 output logits.  batch=300 (non-multiple of 8 and of the tile) exercises the
    # batch-padding path and a 2-step grid.
    input_size, output_size, hidden_layers = 16, 4, [32, 32]
    batch = 300

    key = jax.random.PRNGKey(0)
    key, kx = jax.random.split(key)
    x = jax.random.normal(kx, (batch, input_size), jnp.float32)
    params = init_params(key, input_size, output_size, hidden_layers)

    fwd = jax.jit(functools.partial(network_reduced_forward, tile_m=256))
    out = jax.block_until_ready(fwd(x, params))

    ref = reference_forward(x, params)           # same bf16/f32 mixed precision
    ref_f32 = reference_forward_f32(x, params)   # full-precision semantics check

    assert out.shape == (batch, output_size)
    assert jnp.allclose(out, ref, atol=1e-3, rtol=1e-3), "mismatch vs bf16 reference"
    assert jnp.allclose(out, ref_f32, atol=5e-2, rtol=5e-2), "mismatch vs f32 reference"

    print("KERNEL_OK")
</pallas_src>

<mosaic_0001>
module attributes {stable_mosaic.version = 11 : i64} {
  func.func @_mlp_kernel(%arg0: i32, %arg1: memref<152x16xf32, #tpu.memory_space<vmem>>, %arg2: memref<16x32xbf16, #tpu.memory_space<vmem>>, %arg3: memref<1x32xf32, #tpu.memory_space<vmem>>, %arg4: memref<32x32xbf16, #tpu.memory_space<vmem>>, %arg5: memref<1x32xf32, #tpu.memory_space<vmem>>, %arg6: memref<32x128xbf16, #tpu.memory_space<vmem>>, %arg7: memref<1x128xf32, #tpu.memory_space<vmem>>, %arg8: memref<152x128xf32, #tpu.memory_space<vmem>>) attributes {dimension_semantics = [#tpu.dimension_semantics<parallel>], iteration_bounds = array<i64: 2>, scalar_prefetch = 0 : i64, scratch_operands = 0 : i64, tpu.core_type = #tpu.core_type<tc>, window_params = [{transform_indices = @transform_0, window_bounds = array<i64: 152, 16>}, {pipeline_mode = #tpu.pipeline_mode<synchronous>, transform_indices = @transform_1, window_bounds = array<i64: 16, 32>}, {pipeline_mode = #tpu.pipeline_mode<synchronous>, transform_indices = @transform_2, window_bounds = array<i64: 1, 32>}, {pipeline_mode = #tpu.pipeline_mode<synchronous>, transform_indices = @transform_3, window_bounds = array<i64: 32, 32>}, {pipeline_mode = #tpu.pipeline_mode<synchronous>, transform_indices = @transform_4, window_bounds = array<i64: 1, 32>}, {pipeline_mode = #tpu.pipeline_mode<synchronous>, transform_indices = @transform_5, window_bounds = array<i64: 32, 128>}, {pipeline_mode = #tpu.pipeline_mode<synchronous>, transform_indices = @transform_6, window_bounds = array<i64: 1, 128>}, {transform_indices = @transform_7, window_bounds = array<i64: 152, 128>}]} {
    %c0 = arith.constant 0 : index
    %c0_0 = arith.constant 0 : index
    %0 = vector.load %arg1[%c0, %c0_0] : memref<152x16xf32, #tpu.memory_space<vmem>>, vector<152x16xf32>
    %1 = arith.truncf %0 : vector<152x16xf32> to vector<152x16xbf16>
    %c0_1 = arith.constant 0 : index
    %c0_2 = arith.constant 0 : index
    %2 = vector.load %arg2[%c0_1, %c0_2] : memref<16x32xbf16, #tpu.memory_space<vmem>>, vector<16x32xbf16>
    %c0_3 = arith.constant 0 : index
    %c0_4 = arith.constant 0 : index
    %3 = vector.load %arg3[%c0_3, %c0_4] : memref<1x32xf32, #tpu.memory_space<vmem>>, vector<1x32xf32>
    %cst = arith.constant dense<0.000000e+00> : vector<152x32xf32>
    %4 = tpu.matmul %1, %2, %cst {dimension_numbers = #tpu.dot_dimension_numbers<[1], [0], [0], [1], [0, 0, 1, 1], [], []>} : vector<152x16xbf16>, vector<16x32xbf16>, vector<152x32xf32> -> vector<152x32xf32>
    %5 = vector.broadcast %3 : vector<1x32xf32> to vector<152x32xf32>
    %6 = arith.addf %4, %5 : vector<152x32xf32>
    %cst_5 = arith.constant 0.000000e+00 : f32
    %7 = vector.broadcast %cst_5 : f32 to vector<152x32xf32>
    %8 = arith.maximumf %6, %7 : vector<152x32xf32>
    %9 = arith.truncf %8 : vector<152x32xf32> to vector<152x32xbf16>
    %c0_6 = arith.constant 0 : index
    %c0_7 = arith.constant 0 : index
    %10 = vector.load %arg4[%c0_6, %c0_7] : memref<32x32xbf16, #tpu.memory_space<vmem>>, vector<32x32xbf16>
    %c0_8 = arith.constant 0 : index
    %c0_9 = arith.constant 0 : index
    %11 = vector.load %arg5[%c0_8, %c0_9] : memref<1x32xf32, #tpu.memory_space<vmem>>, vector<1x32xf32>
    %cst_10 = arith.constant dense<0.000000e+00> : vector<152x32xf32>
    %12 = tpu.matmul %9, %10, %cst_10 {dimension_numbers = #tpu.dot_dimension_numbers<[1], [0], [0], [1], [0, 0, 1, 1], [], []>} : vector<152x32xbf16>, vector<32x32xbf16>, vector<152x32xf32> -> vector<152x32xf32>
    %13 = vector.broadcast %11 : vector<1x32xf32> to vector<152x32xf32>
    %14 = arith.addf %12, %13 : vector<152x32xf32>
    %cst_11 = arith.constant 0.000000e+00 : f32
    %15 = vector.broadcast %cst_11 : f32 to vector<152x32xf32>
    %16 = arith.maximumf %14, %15 : vector<152x32xf32>
    %17 = arith.truncf %16 : vector<152x32xf32> to vector<152x32xbf16>
    %c0_12 = arith.constant 0 : index
    %c0_13 = arith.constant 0 : index
    %18 = vector.load %arg6[%c0_12, %c0_13] : memref<32x128xbf16, #tpu.memory_space<vmem>>, vector<32x128xbf16>
    %c0_14 = arith.constant 0 : index
    %c0_15 = arith.constant 0 : index
    %19 = vector.load %arg7[%c0_14, %c0_15] : memref<1x128xf32, #tpu.memory_space<vmem>>, vector<1x128xf32>
    %cst_16 = arith.constant dense<0.000000e+00> : vector<152x128xf32>
    %20 = tpu.matmul %17, %18, %cst_16 {dimension_numbers = #tpu.dot_dimension_numbers<[1], [0], [0], [1], [0, 0, 1, 1], [], []>} : vector<152x32xbf16>, vector<32x128xbf16>, vector<152x128xf32> -> vector<152x128xf32>
    %21 = vector.broadcast %19 : vector<1x128xf32> to vector<152x128xf32>
    %22 = arith.addf %20, %21 : vector<152x128xf32>
    %c0_17 = arith.constant 0 : index
    %c0_18 = arith.constant 0 : index
    %23 = vector.load %arg8[%c0_17, %c0_18] : memref<152x128xf32, #tpu.memory_space<vmem>>, vector<152x128xf32>
    tpu.vector_store %arg8[%c0_17, %c0_18], %22 {strides = array<i32>} : memref<152x128xf32, #tpu.memory_space<vmem>>, vector<152x128xf32>,
    return
  }
  func.func @transform_0(%arg0: i32) -> (i32, i32) {
    %c0_i32 = arith.constant 0 : i32
    %c0_i32_0 = arith.constant 0 : i32
    return %arg0, %c0_i32 : i32, i32
  }
  func.func @transform_1(%arg0: i32) -> (i32, i32) {
    %c0_i32 = arith.constant 0 : i32
    %c0_i32_0 = arith.constant 0 : i32
    %c0_i32_1 = arith.constant 0 : i32
    return %c0_i32, %c0_i32_0 : i32, i32
  }
  func.func @transform_2(%arg0: i32) -> (i32, i32) {
    %c0_i32 = arith.constant 0 : i32
    %c0_i32_0 = arith.constant 0 : i32
    %c0_i32_1 = arith.constant 0 : i32
    return %c0_i32, %c0_i32_0 : i32, i32
  }
  func.func @transform_3(%arg0: i32) -> (i32, i32) {
    %c0_i32 = arith.constant 0 : i32
    %c0_i32_0 = arith.constant 0 : i32
    %c0_i32_1 = arith.constant 0 : i32
    return %c0_i32, %c0_i32_0 : i32, i32
  }
  func.func @transform_4(%arg0: i32) -> (i32, i32) {
    %c0_i32 = arith.constant 0 : i32
    %c0_i32_0 = arith.constant 0 : i32
    %c0_i32_1 = arith.constant 0 : i32
    return %c0_i32, %c0_i32_0 : i32, i32
  }
  func.func @transform_5(%arg0: i32) -> (i32, i32) {
    %c0_i32 = arith.constant 0 : i32
    %c0_i32_0 = arith.constant 0 : i32
    %c0_i32_1 = arith.constant 0 : i32
    return %c0_i32, %c0_i32_0 : i32, i32
  }
  func.func @transform_6(%arg0: i32) -> (i32, i32) {
    %c0_i32 = arith.constant 0 : i32
    %c0_i32_0 = arith.constant 0 : i32
    %c0_i32_1 = arith.constant 0 : i32
    return %c0_i32, %c0_i32_0 : i32, i32
  }
  func.func @transform_7(%arg0: i32) -> (i32, i32) {
    %c0_i32 = arith.constant 0 : i32
    %c0_i32_0 = arith.constant 0 : i32
    return %arg0, %c0_i32 : i32, i32
  }
}

</mosaic_0001>

<bundles_post_ra>
// kernel: network_reduced_forward.1
= control target key start
LH: loop header
LB: loop body
LE: loop exit
PB: predicated region body
PF: predicated region fallthrough
CT: control target
= control target key end

     0   :  { %s1149_s24 = smov 0   ;;  %s1311_s0 = inlined_call_operand.vmem [shape: f32[304,16], index: 0, kind: input, shape index: {}]   ;;  %s1312_s1 = inlined_call_operand.vmem [shape: bf16[16,32], index: 1, kind: input, shape index: {}]   ;;  %s1313_s2 = inlined_call_operand.vmem [shape: f32[1,32], index: 2, kind: input, shape index: {}]   ;;  %s1314_s3 = inlined_call_operand.vmem [shape: bf16[32,32], index: 3, kind: input, shape index: {}]   ;;  %s1315_s4 = inlined_call_operand.vmem [shape: f32[1,32], index: 4, kind: input, shape index: {}]   ;;  %s1316_s5 = inlined_call_operand.vmem [shape: bf16[32,128], index: 5, kind: input, shape index: {}]   ;;  %s1317_s6 = inlined_call_operand.vmem [shape: f32[1,128], index: 6, kind: input, shape index: {}]   ;;  %s1318_s7 = inlined_call_operand.vmem [shape: f32[304,128], index: 7, kind: output, shape index: {}]  }
   0x1 LB: > { %s934_s25 = sadd.s32 4294967295, %s1107_s24   ;;  %p938_p0 = scmp.ge.s32.totalorder %s1107_s24, 1  ;;  %s1107_s24 = sphi %s1149_s24, %s17_s24  }
   0x2   : > { %p238_p1 = scmp.lt.s32.totalorder %s1107_s24, 3 }
   0x4   : > { %p239_p2 = pnand %p938_p0, %p238_p1 }
   0x5   : > { %v1096_v0 = vld [vmem:[%s1312_s1] sm:$0xff] (!%p239_p2)   ;;  %s270_s28 = smul.u32 (!%p239_p2), 19, %s934_s25  ;;  %vm327_vm0 = vcmask (!%p239_p2), 130048   ;;  %v1098_v31 = vld [vmem:[%s1314_s3 + $0x8] sm:$0xff] (!%p239_p2)   ;;  %vm522_vm1 = vcmask (!%p239_p2), 261120  }
   0x6   : > { %242 = sbr.rel (%p239_p2) target bundleno = 714 (0x2ca), region = 48  ;;  %v1097_v1 = vld [vmem:[%s1314_s3] sm:$0xff] (!%p239_p2)   ;;  %1016 = vmatprep.subr.bf16.mxu0 (!%p239_p2), %v1096_v0  ;;  %1086 = vmatprep.subr.bf16.mxu1 (!%p239_p2), %v1096_v0  ;;  %v1100_v33 = vld [vmem:[%s1316_s5 + $0x8] sm:$0xff] (!%p239_p2)  }
   0x7   : > { %p271_p3 = scmp.lt.s32.totalorder (!%p239_p2), %s270_s28, 37  ;;  %1017 = vmatpush3.bf16.msra.mxu0 (!%p239_p2), %v1096_v0  ;;  %1087 = vmatpush3.bf16.msra.mxu1 (!%p239_p2), %v1096_v0  ;;  %v1099_v32 = vld [vmem:[%s1316_s5] sm:$0xff] (!%p239_p2)  }
   0x8   : > { %1038 = vmatprep.subr.bf16.mxu1 (!%p239_p2), %v1097_v1  ;;  %1062 = vmatprep.subr.bf16.mxu0 (!%p239_p2), %v1099_v32  ;;  %v1214_v34 = vld [vmem:[%s1313_s2] ss:$0 sm:$0xff] (!%p239_p2) }
   0xd   : > { %s1320_s28 = smov (!%p271_p3, %s270_s28), 37 }
   0xe   : > { %s939_s8 = sshll.u32 %s1320_s28, 3 }
   0xf   : > { %s1171_s11 = scalar_lea.vmem %s1311_s0, %s939_s8  ;;  %s1287_s27 = scalar_lea.vmem %s1318_s7, %s939_s8 }
  0x10   : > { %v283_v2 = vld [vmem:[%s1171_s11] sm:$0xff]  ;;  %v284_v3 = vld [vmem:[%s1171_s11 + $0x8] sm:$0xff]  ;;  %v285_v4 = vld [vmem:[%s1171_s11 + $0x10] sm:$0xff] }
  0x11   : > { %v302_v5 = vpack.c.bf16 %v284_v3, %v283_v2  ;;  %v286_v6 = vld [vmem:[%s1171_s11 + $0x18] sm:$0xff]  ;;  %v287_v7 = vld [vmem:[%s1171_s11 + $0x20] sm:$0xff]  ;;  %v288_v8 = vld [vmem:[%s1171_s11 + $0x28] sm:$0xff] }
  0x12   : > { %v303_v9 = vpack.c.bf16 %v286_v6, %v285_v4  ;;  %v304_v10 = vpack.c.bf16 %v288_v8, %v287_v7  ;;  %v289_v11 = vld [vmem:[%s1171_s11 + $0x30] sm:$0xff]  ;;  %v290_v12 = vld [vmem:[%s1171_s11 + $0x38] sm:$0xff]  ;;  %v295_v13 = vld [vmem:[%s1171_s11 + $0x60] sm:$0xff] }
  0x13   : > { %1018 = vmatprep.mubr.msk.bf16.mxu0 %vm327_vm0, %v302_v5  ;;  %v296_v14 = vld [vmem:[%s1171_s11 + $0x68] sm:$0xff]  ;;  %v297_v15 = vld [vmem:[%s1171_s11 + $0x70] sm:$0xff]  ;;  %v298_v17 = vld [vmem:[%s1171_s11 + $0x78] sm:$0xff]  ;;  %v305_v24 = vpack.c.bf16 %v290_v12, %v289_v11 }
  0x14   : > { %1019 = vmatmul.mubr.msk.bf16.vlgmr.msra.gmra.mrb[0].mxu0 %vm327_vm0, %v303_v9  ;;  %v308_v16 = vpack.c.bf16 %v296_v14, %v295_v13  ;;  %v299_v18 = vld [vmem:[%s1171_s11 + $0x80] sm:$0xff]  ;;  %v300_v19 = vld [vmem:[%s1171_s11 + $0x88] sm:$0xff]  ;;  %v309_v22 = vpack.c.bf16 %v298_v17, %v297_v15  ;;  %v301_v26 = vld [vmem:[%s1171_s11 + $0x90] sm:$0xff] }
  0x15   : > { %1022 = vmatprep.mubr.msk.bf16.mxu0 %vm327_vm0, %v304_v10  ;;  %v291_v20 = vld [vmem:[%s1171_s11 + $0x40] sm:$0xff]  ;;  %v292_v21 = vld [vmem:[%s1171_s11 + $0x48] sm:$0xff]  ;;  %v310_v23 = vpack.c.bf16 %v300_v19, %v299_v18  ;;  %v311_v27 = vpack.c.bf16 %v301_v26, %v301_v26  ;;  %v293_v28 = vld [vmem:[%s1171_s11 + $0x50] sm:$0xff]  ;;  %1063 = vmatpush3.bf16.msra.mxu0 %v1099_v32 }
  0x16   : > { %1030 = vmatprep.mubr.msk.bf16.mxu1 %vm327_vm0, %v308_v16  ;;  %v306_v25 = vpack.c.bf16 %v292_v21, %v291_v20  ;;  %v294_v29 = vld [vmem:[%s1171_s11 + $0x58] sm:$0xff]  ;;  %1064 = vmatprep.subr.bf16.mxu0 %v1100_v33 }
  0x17   : > { %1031 = vmatmul.mubr.msk.bf16.vlgmr.msra.gmra.mrb[0].mxu1 %vm327_vm0, %v309_v22  ;;  %v307_v30 = vpack.c.bf16 %v294_v29, %v293_v28 }
  0x18   : > { %1034 = vmatprep.mubr.msk.bf16.mxu1 %vm327_vm0, %v310_v23  ;;  %1039 = vmatpush3.bf16.msra.mxu1 %v1097_v1 }
  0x19   : > { %1040 = vmatprep.subr.bf16.mxu1 %v1098_v31  ;;  %1065 = vmatpush3.bf16.msra.mxu0 %v1100_v33 }
  0x1c   : > { %1023 = vmatmul.mubr.msk.bf16.gmra.mrb[4].mxu0 %vm327_vm0, %v305_v24  ;;  %1041 = vmatpush3.bf16.msra.mxu1 %v1098_v31 }
  0x1d   : > { %1026 = vmatprep.mubr.msk.bf16.mxu0 %vm327_vm0, %v306_v25 }
  0x1f   : > { %1035 = vmatmul.mubr.msk.bf16.gmra.mrb[4].mxu1 %vm327_vm0, %v311_v27 }
  0x24   : > { %1027 = vmatmul.mubr.msk.bf16.gmra.mrb[8].mxu0 %vm327_vm0, %v307_v30 }
  0xe7   : > { %v1020_v35 = vpop.f32.mrb[0].mxu0 }
  0xe8   : > { %v401_v36 = vadd.f32 %v1020_v35, %v1214_v34  ;;  %v392_v37 = vpop.f32.mrb[1].mxu0 }
  0xe9   : > { %v393_v38 = vadd.f32 %v1214_v34, %v392_v37  ;;  %v1021_v39 = vpop.f32.mrb[2].mxu0 }
  0xea   : > { %v404_v40 = vadd.f32 %v1021_v39, %v1214_v34  ;;  %v395_v41 = vpop.f32.mrb[3].mxu0  ;;  %v1032_v43 = vpop.f32.mrb[0].mxu1  ;;  %v472_v44 = vmax.f32 %v401_v36, 0.0 }
  0xeb   : > { %v396_v42 = vadd.f32 %v1214_v34, %v395_v41  ;;  %v449_v46 = vadd.f32 %v1032_v43, %v1214_v34  ;;  %v440_v47 = vpop.f32.mrb[1].mxu1  ;;  %v470_v48 = vmax.f32 %v393_v38, 0.0 }
  0xec   : > { %v473_v45 = vmax.f32 %v404_v40, 0.0  ;;  %v441_v50 = vadd.f32 %v1214_v34, %v440_v47  ;;  %v1033_v51 = vpop.f32.mrb[2].mxu1  ;;  %v1248_v40 = vld [vmem:[%s1315_s4] ss:$0 sm:$0xff] }
  0xed   : > { %v471_v49 = vmax.f32 %v396_v42, 0.0  ;;  %v484_v53 = vmax.f32 %v449_v46, 0.0  ;;  %v452_v54 = vadd.f32 %v1033_v51, %v1214_v34  ;;  %v443_v55 = vpop.f32.mrb[3].mxu1 }
  0xee   : > { %v490_v52 = vpack.c.bf16 %v473_v45, %v472_v44  ;;  %v482_v58 = vmax.f32 %v441_v50, 0.0  ;;  %v444_v59 = vadd.f32 %v1214_v34, %v443_v55 }
  0xef   : > { %v489_v56 = vpack.c.bf16 %v471_v49, %v470_v48  ;;  %v1024_v57 = vpop.f32.mrb[4].mxu0  ;;  %v485_v62 = vmax.f32 %v452_v54, 0.0 }
  0xf0   : > { %v417_v60 = vadd.f32 %v1024_v57, %v1214_v34  ;;  %v408_v61 = vpop.f32.mrb[5].mxu0  ;;  %v483_v1 = vmax.f32 %v444_v59, 0.0 }
  0xf1   : > { %v409_v63 = vadd.f32 %v1214_v34, %v408_v61  ;;  %v1025_v0 = vpop.f32.mrb[6].mxu0  ;;  %1042 = vmatprep.mubr.msk.bf16.mxu1 %vm522_vm1, %v489_v56  ;;  %v496_v4 = vpack.c.bf16 %v485_v62, %v484_v53 }
  0xf2   : > { %v420_v2 = vadd.f32 %v1025_v0, %v1214_v34  ;;  %v411_v3 = vpop.f32.mrb[7].mxu0  ;;  %1043 = vmatmul.mubr.msk.bf16.vlgmr.msra.gmra.mrb[8].mxu1 %vm522_vm1, %v490_v52  ;;  %v495_v6 = vpack.c.bf16 %v483_v1, %v482_v58  ;;  %v1036_v7 = vpop.f32.mrb[4].mxu1  ;;  %v476_v8 = vmax.f32 %v417_v60, 0.0 }
  0xf3   : > { %v412_v5 = vadd.f32 %v1214_v34, %v411_v3  ;;  %v456_v10 = vpop.f32.mrb[5].mxu1  ;;  %v474_v11 = vmax.f32 %v409_v63, 0.0  ;;  %v465_v37 = vadd.f32 %v1036_v7, %v1214_v34 }
  0xf4   : > { %v477_v9 = vmax.f32 %v420_v2, 0.0  ;;  %v457_v13 = vadd.f32 %v1214_v34, %v456_v10  ;;  %v1037_v14 = vpop.f32.mrb[6].mxu1 }
  0xf5   : > { %v475_v12 = vmax.f32 %v412_v5, 0.0  ;;  %v459_v16 = vpop.f32.mrb[7].mxu1  ;;  %v488_v38 = vmax.f32 %v465_v37, 0.0 }
  0xf6   : > { %v492_v15 = vpack.c.bf16 %v477_v9, %v476_v8  ;;  %v486_v19 = vmax.f32 %v457_v13, 0.0  ;;  %v460_v20 = vadd.f32 %v1214_v34, %v459_v16 }
  0xf7   : > { %v491_v17 = vpack.c.bf16 %v475_v12, %v474_v11  ;;  %v1028_v18 = vpop.f32.mrb[8].mxu0  ;;  %v498_v39 = vpack.c.bf16 %v488_v38, %v488_v38 }
  0xf8   : > { %v433_v21 = vadd.f32 %v1028_v18, %v1214_v34  ;;  %v424_v22 = vpop.f32.mrb[9].mxu0  ;;  %v487_v25 = vmax.f32 %v460_v20, 0.0 }
  0xf9   : > { %v425_v23 = vadd.f32 %v1214_v34, %v424_v22  ;;  %v1029_v24 = vpop.f32.mrb[10].mxu0  ;;  %1046 = vmatprep.mubr.msk.bf16.mxu1 %vm522_vm1, %v491_v17 }
  0xfa   : > { %v436_v26 = vadd.f32 %v1029_v24, %v1214_v34  ;;  %v427_v27 = vpop.f32.mrb[11].mxu0  ;;  %1047 = vmatmul.mubr.msk.bf16.gmra.mrb[12].mxu1 %vm522_vm1, %v492_v15  ;;  %v497_v29 = vpack.c.bf16 %v487_v25, %v486_v19  ;;  %v480_v30 = vmax.f32 %v433_v21, 0.0 }
  0xfb   : > { %v428_v28 = vadd.f32 %v1214_v34, %v427_v27  ;;  %v478_v32 = vmax.f32 %v425_v23, 0.0 }
  0xfc   : > { %v481_v31 = vmax.f32 %v436_v26, 0.0 }
  0xfd   : > { %v479_v33 = vmax.f32 %v428_v28, 0.0 }
  0xfe   : > { %v494_v35 = vpack.c.bf16 %v481_v31, %v480_v30 }
  0xff   : > { %v493_v36 = vpack.c.bf16 %v479_v33, %v478_v32 }
 0x101   : > { %1050 = vmatprep.mubr.msk.bf16.mxu1 %vm522_vm1, %v493_v36 }
 0x102   : > { %1051 = vmatmul.mubr.msk.bf16.gmra.mrb[16].mxu1 %vm522_vm1, %v494_v35 }
 0x103   : > { %1054 = vmatprep.mubr.msk.bf16.mxu1 %vm522_vm1, %v495_v6 }
 0x10a   : > { %1055 = vmatmul.mubr.msk.bf16.gmra.mrb[20].mxu1 %vm522_vm1, %v496_v4 }
 0x10b   : > { %1058 = vmatprep.mubr.msk.bf16.mxu1 %vm522_vm1, %v497_v29 }
 0x112   : > { %1059 = vmatmul.mubr.msk.bf16.gmra.mrb[24].mxu1 %vm522_vm1, %v498_v39 }
 0x1c5   : > { %v1044_v41 = vpop.f32.mrb[8].mxu1 }
 0x1c6   : > { %v596_v42 = vadd.f32 %v1044_v41, %v1248_v40  ;;  %v587_v43 = vpop.f32.mrb[9].mxu1 }
 0x1c7   : > { %v588_v44 = vadd.f32 %v1248_v40, %v587_v43  ;;  %v1045_v34 = vpop.f32.mrb[10].mxu1 }
 0x1c8   : > { %v599_v45 = vadd.f32 %v1045_v34, %v1248_v40  ;;  %v590_v46 = vpop.f32.mrb[11].mxu1  ;;  %v667_v48 = vmax.f32 %v596_v42, 0.0 }
 0x1c9   : > { %v591_v47 = vadd.f32 %v1248_v40, %v590_v46  ;;  %v665_v50 = vmax.f32 %v588_v44, 0.0 }
 0x1ca   : > { %v668_v49 = vmax.f32 %v599_v45, 0.0  ;;  %v966_v45 = vld [vmem:[%s1317_s6] ss:$0 sm:$0xff] }
 0x1cb   : > { %v666_v51 = vmax.f32 %v591_v47, 0.0 }
 0x1cc   : > { %v685_v52 = vpack.c.bf16 %v668_v49, %v667_v48 }
 0x1cd   : > { %v684_v53 = vpack.c.bf16 %v666_v51, %v665_v50  ;;  %v1048_v54 = vpop.f32.mrb[12].mxu1 }
 0x1ce   : > { %v612_v55 = vadd.f32 %v1048_v54, %v1248_v40  ;;  %v603_v56 = vpop.f32.mrb[13].mxu1 }
 0x1cf   : > { %v604_v57 = vadd.f32 %v1248_v40, %v603_v56  ;;  %v1049_v58 = vpop.f32.mrb[14].mxu1  ;;  %1066 = vmatprep.mubr.msk.bf16.mxu0 %vm522_vm1, %v684_v53 }
 0x1d0   : > { %v615_v59 = vadd.f32 %v1049_v58, %v1248_v40  ;;  %v606_v60 = vpop.f32.mrb[15].mxu1  ;;  %1067 = vmatmul.mubr.msk.bf16.vlgmr.msra.gmra.mrb[12].mxu0 %vm522_vm1, %v685_v52  ;;  %v671_v62 = vmax.f32 %v612_v55, 0.0 }
 0x1d1   : > { %v607_v61 = vadd.f32 %v1248_v40, %v606_v60  ;;  %v669_v0 = vmax.f32 %v604_v57, 0.0 }
 0x1d2   : > { %v672_v63 = vmax.f32 %v615_v59, 0.0 }
 0x1d3   : > { %v670_v1 = vmax.f32 %v607_v61, 0.0 }
 0x1d4   : > { %v687_v2 = vpack.c.bf16 %v672_v63, %v671_v62 }
 0x1d5   : > { %v686_v3 = vpack.c.bf16 %v670_v1, %v669_v0  ;;  %v1052_v4 = vpop.f32.mrb[16].mxu1 }
 0x1d6   : > { %v628_v5 = vadd.f32 %v1052_v4, %v1248_v40  ;;  %v619_v6 = vpop.f32.mrb[17].mxu1 }
 0x1d7   : > { %v620_v7 = vadd.f32 %v1248_v40, %v619_v6  ;;  %v1053_v8 = vpop.f32.mrb[18].mxu1  ;;  %1070 = vmatprep.mubr.msk.bf16.mxu0 %vm522_vm1, %v686_v3 }
 0x1d8   : > { %v631_v9 = vadd.f32 %v1053_v8, %v1248_v40  ;;  %v622_v10 = vpop.f32.mrb[19].mxu1  ;;  %1071 = vmatmul.mubr.msk.bf16.gmra.mrb[16].mxu0 %vm522_vm1, %v687_v2  ;;  %v675_v12 = vmax.f32 %v628_v5, 0.0 }
 0x1d9   : > { %v623_v11 = vadd.f32 %v1248_v40, %v622_v10  ;;  %v673_v14 = vmax.f32 %v620_v7, 0.0 }
 0x1da   : > { %v676_v13 = vmax.f32 %v631_v9, 0.0 }
 0x1db   : > { %v674_v15 = vmax.f32 %v623_v11, 0.0 }
 0x1dc   : > { %v689_v16 = vpack.c.bf16 %v676_v13, %v675_v12 }
 0x1dd   : > { %v688_v17 = vpack.c.bf16 %v674_v15, %v673_v14  ;;  %v1056_v18 = vpop.f32.mrb[20].mxu1 }
 0x1de   : > { %v644_v19 = vadd.f32 %v1056_v18, %v1248_v40  ;;  %v635_v20 = vpop.f32.mrb[21].mxu1 }
 0x1df   : > { %v636_v21 = vadd.f32 %v1248_v40, %v635_v20  ;;  %v1057_v22 = vpop.f32.mrb[22].mxu1  ;;  %1074 = vmatprep.mubr.msk.bf16.mxu0 %vm522_vm1, %v688_v17 }
 0x1e0   : > { %v647_v23 = vadd.f32 %v1057_v22, %v1248_v40  ;;  %v638_v24 = vpop.f32.mrb[23].mxu1  ;;  %1075 = vmatmul.mubr.msk.bf16.gmra.mrb[20].mxu0 %vm522_vm1, %v689_v16  ;;  %v679_v26 = vmax.f32 %v644_v19, 0.0 }
 0x1e1   : > { %v639_v25 = vadd.f32 %v1248_v40, %v638_v24  ;;  %v677_v28 = vmax.f32 %v636_v21, 0.0 }
 0x1e2   : > { %v680_v27 = vmax.f32 %v647_v23, 0.0 }
 0x1e3   : > { %v678_v29 = vmax.f32 %v639_v25, 0.0 }
 0x1e4   : > { %v691_v30 = vpack.c.bf16 %v680_v27, %v679_v26 }
 0x1e5   : > { %v690_v31 = vpack.c.bf16 %v678_v29, %v677_v28  ;;  %v1060_v32 = vpop.f32.mrb[24].mxu1 }
 0x1e6   : > { %v660_v33 = vadd.f32 %v1060_v32, %v1248_v40  ;;  %v651_v35 = vpop.f32.mrb[25].mxu1 }
 0x1e7   : > { %v652_v36 = vadd.f32 %v1248_v40, %v651_v35  ;;  %v1061_v37 = vpop.f32.mrb[26].mxu1  ;;  %1078 = vmatprep.mubr.msk.bf16.mxu0 %vm522_vm1, %v690_v31 }
 0x1e8   : > { %v654_v38 = vpop.f32.mrb[27].mxu1  ;;  %1079 = vmatmul.mubr.msk.bf16.gmra.mrb[24].mxu0 %vm522_vm1, %v691_v30  ;;  %v683_v41 = vmax.f32 %v660_v33, 0.0 }
 0x1e9   : > { %v655_v39 = vadd.f32 %v1248_v40, %v654_v38  ;;  %v681_v42 = vmax.f32 %v652_v36, 0.0 }
 0x1ea   : > { %v693_v34 = vpack.c.bf16 %v683_v41, %v683_v41 }
 0x1eb   : > { %v682_v43 = vmax.f32 %v655_v39, 0.0 }
 0x1ed   : > { %v692_v44 = vpack.c.bf16 %v682_v43, %v681_v42 }
 0x1ef   : > { %1082 = vmatprep.mubr.msk.bf16.mxu0 %vm522_vm1, %v692_v44 }
 0x1f0   : > { %1083 = vmatmul.mubr.msk.bf16.gmra.mrb[28].mxu0 %vm522_vm1, %v693_v34 }
 0x2a3   : > { %v1068_v40 = vpop.f32.mrb[12].mxu0 }
 0x2a4   : > { %v790_v46 = vadd.f32 %v1068_v40, %v966_v45  ;;  %v781_v47 = vpop.f32.mrb[13].mxu0 }
 0x2a5   : > { %v782_v48 = vadd.f32 %v966_v45, %v781_v47  ;;  %v1069_v49 = vpop.f32.mrb[14].mxu0 }
 0x2a6   : > { %861 = vst [vmem:[%s1287_s27 + $0x10] sm:$0xff] %v790_v46  ;;  %v793_v50 = vadd.f32 %v1069_v49, %v966_v45  ;;  %v784_v51 = vpop.f32.mrb[15].mxu0 }
 0x2a7   : > { %859 = vst [vmem:[%s1287_s27] sm:$0xff] %v782_v48  ;;  %v785_v52 = vadd.f32 %v966_v45, %v784_v51 }
 0x2a8   : > { %862 = vst [vmem:[%s1287_s27 + $0x18] sm:$0xff] %v793_v50 }
 0x2a9   : > { %860 = vst [vmem:[%s1287_s27 + $0x8] sm:$0xff] %v785_v52 }
 0x2ab   : > { %v1072_v53 = vpop.f32.mrb[16].mxu0 }
 0x2ac   : > { %v806_v54 = vadd.f32 %v1072_v53, %v966_v45  ;;  %v797_v55 = vpop.f32.mrb[17].mxu0 }
 0x2ad   : > { %v798_v56 = vadd.f32 %v966_v45, %v797_v55  ;;  %v1073_v57 = vpop.f32.mrb[18].mxu0 }
 0x2ae   : > { %865 = vst [vmem:[%s1287_s27 + $0x30] sm:$0xff] %v806_v54  ;;  %v809_v58 = vadd.f32 %v1073_v57, %v966_v45  ;;  %v800_v59 = vpop.f32.mrb[19].mxu0 }
 0x2af   : > { %863 = vst [vmem:[%s1287_s27 + $0x20] sm:$0xff] %v798_v56  ;;  %v801_v60 = vadd.f32 %v966_v45, %v800_v59 }
 0x2b0   : > { %866 = vst [vmem:[%s1287_s27 + $0x38] sm:$0xff] %v809_v58 }
 0x2b1   : > { %864 = vst [vmem:[%s1287_s27 + $0x28] sm:$0xff] %v801_v60 }
 0x2b3   : > { %v1076_v61 = vpop.f32.mrb[20].mxu0 }
 0x2b4   : > { %v822_v62 = vadd.f32 %v1076_v61, %v966_v45  ;;  %v813_v63 = vpop.f32.mrb[21].mxu0 }
 0x2b5   : > { %v814_v0 = vadd.f32 %v966_v45, %v813_v63  ;;  %v1077_v1 = vpop.f32.mrb[22].mxu0 }
 0x2b6   : > { %869 = vst [vmem:[%s1287_s27 + $0x50] sm:$0xff] %v822_v62  ;;  %v825_v2 = vadd.f32 %v1077_v1, %v966_v45  ;;  %v816_v3 = vpop.f32.mrb[23].mxu0 }
 0x2b7   : > { %867 = vst [vmem:[%s1287_s27 + $0x40] sm:$0xff] %v814_v0  ;;  %v817_v4 = vadd.f32 %v966_v45, %v816_v3 }
 0x2b8   : > { %870 = vst [vmem:[%s1287_s27 + $0x58] sm:$0xff] %v825_v2 }
 0x2b9   : > { %868 = vst [vmem:[%s1287_s27 + $0x48] sm:$0xff] %v817_v4 }
 0x2bb   : > { %v1080_v5 = vpop.f32.mrb[24].mxu0 }
 0x2bc   : > { %v838_v6 = vadd.f32 %v1080_v5, %v966_v45  ;;  %v829_v7 = vpop.f32.mrb[25].mxu0 }
 0x2bd   : > { %v830_v8 = vadd.f32 %v966_v45, %v829_v7  ;;  %v1081_v9 = vpop.f32.mrb[26].mxu0 }
 0x2be   : > { %873 = vst [vmem:[%s1287_s27 + $0x70] sm:$0xff] %v838_v6  ;;  %v841_v10 = vadd.f32 %v1081_v9, %v966_v45  ;;  %v832_v11 = vpop.f32.mrb[27].mxu0 }
 0x2bf   : > { %871 = vst [vmem:[%s1287_s27 + $0x60] sm:$0xff] %v830_v8  ;;  %v833_v12 = vadd.f32 %v966_v45, %v832_v11 }
 0x2c0   : > { %874 = vst [vmem:[%s1287_s27 + $0x78] sm:$0xff] %v841_v10 }
 0x2c1   : > { %872 = vst [vmem:[%s1287_s27 + $0x68] sm:$0xff] %v833_v12 }
 0x2c3   : > { %v1084_v13 = vpop.f32.mrb[28].mxu0 }
 0x2c4   : > { %v854_v14 = vadd.f32 %v1084_v13, %v966_v45  ;;  %v845_v15 = vpop.f32.mrb[29].mxu0 }
 0x2c5   : > { %v846_v16 = vadd.f32 %v966_v45, %v845_v15  ;;  %v1085_v17 = vpop.f32.mrb[30].mxu0 }
 0x2c6   : > { %877 = vst [vmem:[%s1287_s27 + $0x90] sm:$0xff] %v854_v14  ;;  %v848_v18 = vpop.f32.mrb[31].mxu0 }
 0x2c7   : > { %875 = vst [vmem:[%s1287_s27 + $0x80] sm:$0xff] %v846_v16  ;;  %v849_v19 = vadd.f32 %v966_v45, %v848_v18 }
 0x2c9   : > { %876 = vst [vmem:[%s1287_s27 + $0x88] sm:$0xff] %v849_v19 }
 0x2ca PF: > { %s17_s24 = sadd.s32 1, %s1107_s24  }
 0x2cb   : > { %p14_p4 = scmp.ge.s32.totalorder %s17_s24, 4  }
 0x2cd   :  { %16 = sbr.rel (!%p14_p4) target bundleno = 1 (0x1), region = 78 }

</bundles_post_ra>
